<compile_context>
chip_gen: v5e
topology: v5e:2x2
jax: 0.10.0
libtpu: 0.0.40
codegen_flags: <defaults>
</compile_context>

<pallas_src>
import functools

import jax
import jax.numpy as jnp
from jax.experimental import pallas as pl
from jax.experimental.pallas import tpu as pltpu

LANE = 128


def _round_up(x, m):
    return (x + m - 1) // m * m


def _pad2(a, rows, cols):
    return jnp.pad(a, ((0, rows - a.shape[0]), (0, cols - a.shape[1])))


def _vmem_limit(block_bytes, scratch_bytes):
    """Double-buffered pipeline blocks + resident scratch + headroom."""
    need = 2 * block_bytes + scratch_bytes + (4 << 20)
    return int(min(max(need, 32 << 20), 48 << 20))


def _pick_tiles(n, nfeat, tm, tk_adj, tk_feat):
    """Shrink tiles for small problems; keep everything 128-aligned and make
    tk_adj a multiple of tm so n_pad divides both the row and K tiles."""
    n128 = _round_up(n, LANE)
    tm = max(LANE, min(tm, n128) // LANE * LANE)
    tk_adj = max(tm, min(tk_adj, _round_up(n, tm)) // tm * tm)
    n_pad = _round_up(n, tk_adj)
    f128 = _round_up(nfeat, LANE)
    tk_feat = max(LANE, min(tk_feat, f128) // LANE * LANE)
    f_pad = _round_up(nfeat, tk_feat)
    return tm, tk_adj, n_pad, tk_feat, f_pad


# ---------------------------------------------------------------------------
# Kernel A:  out = A @ B (+ bias) (optional relu), K-tiled reduction.
# Used for:  support1 = X @ W1     and     out = A @ s2 + b2
# ---------------------------------------------------------------------------
def matmul_bias_kernel(a_ref, b_ref, bias_ref, out_ref, acc_ref, *, apply_relu):
    k = pl.program_id(1)

    @pl.when(k == 0)
    def _():
        acc_ref[...] = jnp.zeros_like(acc_ref)

    acc_ref[...] += jnp.dot(a_ref[...], b_ref[...],
                            preferred_element_type=jnp.float32)

    @pl.when(k == pl.num_programs(1) - 1)
    def _():
        acc = acc_ref[...] + bias_ref[...]          # f32 epilogue
        if apply_relu:
            acc = jnp.maximum(acc, 0.0)
        out_ref[...] = acc.astype(out_ref.dtype)


def matmul_bias(a, b, bias, *, apply_relu, out_dtype, tm, tk):
    M, K = a.shape
    _, Nout = b.shape
    assert M % tm == 0 and K % tk == 0

    out_isz = jnp.dtype(out_dtype).itemsize
    block_bytes = (tm * tk * a.dtype.itemsize
                   + tk * Nout * b.dtype.itemsize
                   + Nout * bias.dtype.itemsize
                   + tm * Nout * out_isz)
    scratch_bytes = tm * Nout * 4
    ce = pl.CostEstimate(
        flops=int(2 * M * K * Nout),
        transcendentals=0,
        bytes_accessed=int(a.size * a.dtype.itemsize
                           + b.size * b.dtype.itemsize
                           + bias.size * bias.dtype.itemsize
                           + M * Nout * out_isz),
    )
    return pl.pallas_call(
        functools.partial(matmul_bias_kernel, apply_relu=apply_relu),
        out_shape=jax.ShapeDtypeStruct((M, Nout), out_dtype),
        grid_spec=pltpu.PrefetchScalarGridSpec(
            num_scalar_prefetch=0,
            grid=(M // tm, K // tk),
            in_specs=[
                pl.BlockSpec((tm, tk), lambda i, k: (i, k)),     # A row/K tile
                pl.BlockSpec((tk, Nout), lambda i, k: (k, 0)),   # B K tile
                pl.BlockSpec((1, Nout), lambda i, k: (0, 0)),    # bias (f32)
            ],
            out_specs=pl.BlockSpec((tm, Nout), lambda i, k: (i, 0)),
            scratch_shapes=[pltpu.VMEM((tm, Nout), jnp.float32)],
        ),
        compiler_params=pltpu.CompilerParams(
            dimension_semantics=("parallel", "arbitrary"),
            vmem_limit_bytes=_vmem_limit(block_bytes, scratch_bytes)),
        cost_estimate=ce,
    )(a, b, bias)


# ---------------------------------------------------------------------------
# Kernel B:  fused layer-1 aggregation + layer-2 projection, K-tiled.
#            s2_tile = relu(sum_k A[i,k] @ s1[k] + b1) @ W2
#            (hidden activation h never leaves VMEM; f32 epilogue)
# ---------------------------------------------------------------------------
def agg_project_kernel(adj_ref, s1_ref, b1_ref, w2_ref, s2_ref, acc_ref):
    k = pl.program_id(1)

    @pl.when(k == 0)
    def _():
        acc_ref[...] = jnp.zeros_like(acc_ref)

    acc_ref[...] += jnp.dot(adj_ref[...], s1_ref[...],
                            preferred_element_type=jnp.float32)

    @pl.when(k == pl.num_programs(1) - 1)
    def _():
        h = jnp.maximum(acc_ref[...] + b1_ref[...], 0.0)        # f32 epilogue
        s2 = jnp.dot(h.astype(jnp.bfloat16), w2_ref[...],
                     preferred_element_type=jnp.float32)
        s2_ref[...] = s2.astype(s2_ref.dtype)


def agg_project(adj, s1, b1, w2, *, tm, tk):
    M, N = adj.shape
    _, H = s1.shape
    _, C = w2.shape
    assert M % tm == 0 and N % tk == 0

    block_bytes = (tm * tk * adj.dtype.itemsize
                   + tk * H * s1.dtype.itemsize
                   + H * b1.dtype.itemsize
                   + H * C * w2.dtype.itemsize
                   + tm * C * 2)
    scratch_bytes = tm * H * 4
    ce = pl.CostEstimate(
        flops=int(2 * M * N * H + 2 * M * H * C),
        transcendentals=0,
        bytes_accessed=int(adj.size * adj.dtype.itemsize
                           + s1.size * s1.dtype.itemsize
                           + b1.size * b1.dtype.itemsize
                           + w2.size * w2.dtype.itemsize
                           + M * C * 2),
    )
    return pl.pallas_call(
        agg_project_kernel,
        out_shape=jax.ShapeDtypeStruct((M, C), jnp.bfloat16),
        grid_spec=pltpu.PrefetchScalarGridSpec(
            num_scalar_prefetch=0,
            grid=(M // tm, N // tk),
            in_specs=[
                pl.BlockSpec((tm, tk), lambda i, k: (i, k)),   # adj row/K tile
                pl.BlockSpec((tk, H), lambda i, k: (k, 0)),    # support1 K tile
                pl.BlockSpec((1, H), lambda i, k: (0, 0)),     # bias 1 (f32)
                pl.BlockSpec((H, C), lambda i, k: (0, 0)),     # W2
            ],
            out_specs=pl.BlockSpec((tm, C), lambda i, k: (i, 0)),
            scratch_shapes=[pltpu.VMEM((tm, H), jnp.float32)],
        ),
        compiler_params=pltpu.CompilerParams(
            dimension_semantics=("parallel", "arbitrary"),
            vmem_limit_bytes=_vmem_limit(block_bytes, scratch_bytes)),
        cost_estimate=ce,
    )(adj, s1, b1, w2)


# ---------------------------------------------------------------------------
# Preparation (hoisted pad + bf16 cast — cache across forward calls)
# ---------------------------------------------------------------------------
def prepare_gcn(x, adj, params, *, tm=256, tk_adj=1024, tk_feat=512):
    """Pad + cast operands once.  For repeated forwards reuse the returned
    dict: re-materializing the padded bf16 adjacency each call costs as much
    HBM traffic as one of the two in-kernel adjacency passes."""
    w1, b1, w2, b2 = params
    N, nfeat = x.shape
    nhid = w1.shape[1]
    nclass = w2.shape[1]

    tm, tk_adj, n_pad, tk_feat, f_pad = _pick_tiles(N, nfeat, tm, tk_adj, tk_feat)
    h_pad = _round_up(nhid, LANE)
    c_pad = _round_up(nclass, LANE)

    bf16 = jnp.bfloat16
    return dict(
        xp=_pad2(x, n_pad, f_pad).astype(bf16),
        adjp=_pad2(adj, n_pad, n_pad).astype(bf16),   # zero column padding!
        w1p=_pad2(w1, f_pad, h_pad).astype(bf16),
        w2p=_pad2(w2, h_pad, c_pad).astype(bf16),
        b1p=jnp.pad(b1, (0, h_pad - nhid)).reshape(1, h_pad).astype(jnp.float32),
        b2p=jnp.pad(b2, (0, c_pad - nclass)).reshape(1, c_pad).astype(jnp.float32),
        zero_b=jnp.zeros((1, h_pad), jnp.float32),
        tm=tm, tk_adj=tk_adj, tk_feat=tk_feat, n=N, nclass=nclass,
    )


def gcn_forward_prepared(prep):
    # support1 = X @ W1   (computed exactly once, row-tiled, K-tiled)
    s1 = matmul_bias(prep["xp"], prep["w1p"], prep["zero_b"],
                     apply_relu=False, out_dtype=jnp.bfloat16,
                     tm=prep["tm"], tk=prep["tk_feat"])
    # s2 = relu(A @ support1 + b1) @ W2   (hidden activation stays in VMEM)
    s2 = agg_project(prep["adjp"], s1, prep["b1p"], prep["w2p"],
                     tm=prep["tm"], tk=prep["tk_adj"])
    # out = A @ s2 + b2
    out = matmul_bias(prep["adjp"], s2, prep["b2p"],
                      apply_relu=False, out_dtype=jnp.float32,
                      tm=prep["tm"], tk=prep["tk_adj"])
    return out[:prep["n"], :prep["nclass"]]


def gcn_forward(x, adj, params, dropout=0.5, **tile_kwargs):
    """GCN.forward in eval mode (F.dropout with training=False is identity)."""
    del dropout
    return gcn_forward_prepared(prepare_gcn(x, adj, params, **tile_kwargs))


# ---------------------------------------------------------------------------
# Init / example-data helpers
# ---------------------------------------------------------------------------
def init_gcn_params(key, nfeat, nhid, nclass):
    """Match GraphConvolution.reset_parameters: U(-1/sqrt(fout), 1/sqrt(fout))."""
    k1, k2, k3, k4 = jax.random.split(key, 4)
    s1 = 1.0 / jnp.sqrt(jnp.float32(nhid))
    s2 = 1.0 / jnp.sqrt(jnp.float32(nclass))
    w1 = jax.random.uniform(k1, (nfeat, nhid), jnp.float32, -s1, s1)
    b1 = jax.random.uniform(k2, (nhid,), jnp.float32, -s1, s1)
    w2 = jax.random.uniform(k3, (nhid, nclass), jnp.float32, -s2, s2)
    b2 = jax.random.uniform(k4, (nclass,), jnp.float32, -s2, s2)
    return (w1, b1, w2, b2)


def make_normalized_adj(key, n):
    """Random symmetric graph with self-loops, D^-1/2 (A+I) D^-1/2, dense f32."""
    a = (jax.random.uniform(key, (n, n)) < 0.1).astype(jnp.float32)
    a = jnp.maximum(a, a.T)
    a = a + jnp.eye(n, dtype=jnp.float32)
    d = jnp.sum(a, axis=1)
    d_inv_sqrt = 1.0 / jnp.sqrt(d)
    return a * d_inv_sqrt[:, None] * d_inv_sqrt[None, :]


if __name__ == "__main__":
    # Small shapes, but large enough to exercise the (row, K) tiled grids:
    # n_pad = 384 -> 3 row tiles x 3 adjacency K tiles with tm = tk = 128.
    N, NFEAT, NHID, NCLASS = 320, 160, 32, 16

    key = jax.random.PRNGKey(0)
    kx, kadj, kparams = jax.random.split(key, 3)

    x = jax.random.normal(kx, (N, NFEAT), dtype=jnp.float32)
    adj = make_normalized_adj(kadj, N)
    params = init_gcn_params(kparams, NFEAT, NHID, NCLASS)

    # Prepare once (cached padded bf16 operands), then forward.
    prep = prepare_gcn(x, adj, params, tm=128, tk_adj=128, tk_feat=128)
    out = gcn_forward_prepared(prep)
    out = jax.block_until_ready(out)
    assert out.shape == (N, NCLASS)

    w1, b1, w2, b2 = params
    bf, f32 = jnp.bfloat16, jnp.float32

    # Reference 1: identical math (bf16 MXU operands, f32 accumulation).
    s1_r = jnp.dot(x.astype(bf), w1.astype(bf),
                   preferred_element_type=f32).astype(bf)
    h_r = jnp.maximum(
        jnp.dot(adj.astype(bf), s1_r, preferred_element_type=f32) + b1, 0.0)
    s2_r = jnp.dot(h_r.astype(bf), w2.astype(bf),
                   preferred_element_type=f32).astype(bf)
    out_r = jnp.dot(adj.astype(bf), s2_r, preferred_element_type=f32) + b2
    assert jnp.allclose(out, out_r, atol=2e-3, rtol=2e-3), "mismatch vs bf16 ref"

    # Reference 2: full-f32 math (loose tolerance, bf16 rounding expected).
    h32 = jnp.maximum(adj @ (x @ w1) + b1, 0.0)
    out32 = adj @ (h32 @ w2) + b2
    assert jnp.allclose(out, out32, atol=5e-2, rtol=5e-2), "mismatch vs f32 ref"

    print("KERNEL_OK")
</pallas_src>

<mosaic_0001>
module attributes {stable_mosaic.version = 11 : i64} {
  func.func @matmul_bias_kernel(%arg0: i32, %arg1: i32, %arg2: memref<128x128xbf16, #tpu.memory_space<vmem>>, %arg3: memref<128x128xbf16, #tpu.memory_space<vmem>>, %arg4: memref<1x128xf32, #tpu.memory_space<vmem>>, %arg5: memref<128x128xbf16, #tpu.memory_space<vmem>>, %arg6: memref<128x128xf32, #tpu.memory_space<vmem>>) attributes {dimension_semantics = [#tpu.dimension_semantics<parallel>, #tpu.dimension_semantics<arbitrary>], iteration_bounds = array<i64: 3, 2>, scalar_prefetch = 0 : i64, scratch_operands = 1 : i64, tpu.core_type = #tpu.core_type<tc>, window_params = [{transform_indices = @transform_0, window_bounds = array<i64: 128, 128>}, {transform_indices = @transform_1, window_bounds = array<i64: 128, 128>}, {pipeline_mode = #tpu.pipeline_mode<synchronous>, transform_indices = @transform_2, window_bounds = array<i64: 1, 128>}, {transform_indices = @transform_3, window_bounds = array<i64: 128, 128>}]} {
    %c0_i32 = arith.constant 0 : i32
    %0 = arith.cmpi eq, %arg1, %c0_i32 : i32
    %1 = arith.extui %0 : i1 to i32
    %c0_i32_0 = arith.constant 0 : i32
    %2 = arith.cmpi ne, %1, %c0_i32_0 : i32
    scf.if %2 {
      %cst_9 = arith.constant 0.000000e+00 : f32
      %12 = vector.broadcast %cst_9 : f32 to vector<128x128xf32>
      %c0_10 = arith.constant 0 : index
      %c0_11 = arith.constant 0 : index
      %13 = vector.load %arg6[%c0_10, %c0_11] : memref<128x128xf32, #tpu.memory_space<vmem>>, vector<128x128xf32>
      tpu.vector_store %arg6[%c0_10, %c0_11], %12 {strides = array<i32>} : memref<128x128xf32, #tpu.memory_space<vmem>>, vector<128x128xf32>,
    } else {
    }
    %c0 = arith.constant 0 : index
    %c0_1 = arith.constant 0 : index
    %3 = vector.load %arg6[%c0, %c0_1] : memref<128x128xf32, #tpu.memory_space<vmem>>, vector<128x128xf32>
    %c0_2 = arith.constant 0 : index
    %c0_3 = arith.constant 0 : index
    %4 = vector.load %arg2[%c0_2, %c0_3] : memref<128x128xbf16, #tpu.memory_space<vmem>>, vector<128x128xbf16>
    %c0_4 = arith.constant 0 : index
    %c0_5 = arith.constant 0 : index
    %5 = vector.load %arg3[%c0_4, %c0_5] : memref<128x128xbf16, #tpu.memory_space<vmem>>, vector<128x128xbf16>
    %cst = arith.constant dense<0.000000e+00> : vector<128x128xf32>
    %6 = tpu.matmul %4, %5, %cst {dimension_numbers = #tpu.dot_dimension_numbers<[1], [0], [0], [1], [0, 0, 1, 1], [], []>} : vector<128x128xbf16>, vector<128x128xbf16>, vector<128x128xf32> -> vector<128x128xf32>
    %7 = arith.addf %3, %6 : vector<128x128xf32>
    %c0_6 = arith.constant 0 : index
    %c0_7 = arith.constant 0 : index
    %8 = vector.load %arg6[%c0_6, %c0_7] : memref<128x128xf32, #tpu.memory_space<vmem>>, vector<128x128xf32>
    tpu.vector_store %arg6[%c0_6, %c0_7], %7 {strides = array<i32>} : memref<128x128xf32, #tpu.memory_space<vmem>>, vector<128x128xf32>,
    %c1_i32 = arith.constant 1 : i32
    %9 = arith.cmpi eq, %arg1, %c1_i32 : i32
    %10 = arith.extui %9 : i1 to i32
    %c0_i32_8 = arith.constant 0 : i32
    %11 = arith.cmpi ne, %10, %c0_i32_8 : i32
    scf.if %11 {
      %c0_9 = arith.constant 0 : index
      %c0_10 = arith.constant 0 : index
      %12 = vector.load %arg6[%c0_9, %c0_10] : memref<128x128xf32, #tpu.memory_space<vmem>>, vector<128x128xf32>
      %c0_11 = arith.constant 0 : index
      %c0_12 = arith.constant 0 : index
      %13 = vector.load %arg4[%c0_11, %c0_12] : memref<1x128xf32, #tpu.memory_space<vmem>>, vector<1x128xf32>
      %14 = vector.broadcast %13 : vector<1x128xf32> to vector<128x128xf32>
      %15 = arith.addf %12, %14 : vector<128x128xf32>
      %16 = arith.truncf %15 : vector<128x128xf32> to vector<128x128xbf16>
      %c0_13 = arith.constant 0 : index
      %c0_14 = arith.constant 0 : index
      %17 = vector.load %arg5[%c0_13, %c0_14] : memref<128x128xbf16, #tpu.memory_space<vmem>>, vector<128x128xbf16>
      tpu.vector_store %arg5[%c0_13, %c0_14], %16 {strides = array<i32>} : memref<128x128xbf16, #tpu.memory_space<vmem>>, vector<128x128xbf16>,
    } else {
    }
    return
  }
  func.func @transform_0(%arg0: i32, %arg1: i32) -> (i32, i32) {
    %c0_i32 = arith.constant 0 : i32
    return %arg0, %arg1 : i32, i32
  }
  func.func @transform_1(%arg0: i32, %arg1: i32) -> (i32, i32) {
    %c0_i32 = arith.constant 0 : i32
    %c0_i32_0 = arith.constant 0 : i32
    return %arg1, %c0_i32 : i32, i32
  }
  func.func @transform_2(%arg0: i32, %arg1: i32) -> (i32, i32) {
    %c0_i32 = arith.constant 0 : i32
    %c0_i32_0 = arith.constant 0 : i32
    %c0_i32_1 = arith.constant 0 : i32
    return %c0_i32, %c0_i32_0 : i32, i32
  }
  func.func @transform_3(%arg0: i32, %arg1: i32) -> (i32, i32) {
    %c0_i32 = arith.constant 0 : i32
    %c0_i32_0 = arith.constant 0 : i32
    return %arg0, %c0_i32 : i32, i32
  }
}

</mosaic_0001>

<bundles_post_ra>
// kernel: tpu_custom_call.1
= control target key start
LH: loop header
LB: loop body
LE: loop exit
PB: predicated region body
PF: predicated region fallthrough
CT: control target
= control target key end

     0   :  { %s1541_s0 = inlined_call_operand.hbm [shape: bf16[384,256], index: 0, kind: input, shape index: {}]   ;;  %s1542_s1 = inlined_call_operand.hbm [shape: bf16[256,128], index: 1, kind: input, shape index: {}]   ;;  %s1543_s2 = inlined_call_operand.vmem [shape: f32[1,128], index: 2, kind: input, shape index: {}]   ;;  %s1544_s3 = inlined_call_operand.hbm [shape: bf16[384,128], index: 3, kind: output, shape index: {}]  }
   0x1   :  { %1552 = sst [smem:[#allocation17_spill]] %s1541_s0 }
   0x2   :  { %1553 = sst [smem:[#allocation18_spill]] %s1542_s1 }
   0x3   :  { %1554 = sst [smem:[#allocation19_spill]] %s1543_s2 }
   0x4   :  { %1555 = sst [smem:[#allocation20_spill]] %s1544_s3 }
   0x5   :  { %8 = vsyncpa [#allocation4], 0 }
   0x6   :  { %10 = vsyncpa [#allocation4 + $0x1], 0 }
   0x7   :  { %11 = vsyncpa [#allocation7], 0 }
   0x8   :  { %13 = vsyncpa [#allocation7 + $0x1], 0 }
   0x9   :  { %14 = vsyncpa [#allocation5], 0 }
   0xa   :  { %16 = vsyncpa [#allocation5 + $0x1], 0  ;;  %s1246_s12 = smov 0   ;;  %s1248_s13 = smov 0  }
   0xb   :  { %s1250_s14 = smov 0   ;;  %s1252_s15 = smov 0  }
   0xc   :  { %s1254_s16 = smov 0   ;;  %s1256_s17 = smov 0  }
   0xd   :  { %s1258_s18 = smov 0   ;;  %s1260_s19 = smov 0  }
   0xe   :  { %s1262_s20 = smov 0   ;;  %s1264_s21 = smov 0  }
   0xf   :  { %s1266_s22 = smov 0   ;;  %s1268_s23 = smov 0  }
  0x10   :  { %s1270_s24 = smov 0   ;;  %s1272_s25 = smov 0  }
  0x11 LB: > { %1556 = sst [smem:[#allocation12_spill]] %s1202_s21  ;;  %s31_s26 = sadd.s32 1, %s1210_s23  ;;  %s1218_s25 = sphi %s1272_s25, %s22_s25   ;;  %s1214_s24 = sphi %s1270_s24, %s1581_s24   ;;  %s1210_s23 = sphi %s1268_s23, %s1592_s23   ;;  %s1206_s22 = sphi %s1266_s22, %s1579_s22   ;;  %s1202_s21 = sphi %s1264_s21, %s1591_s21   ;;  %s1198_s20 = sphi %s1262_s20, %s1590_s20   ;;  %s1194_s19 = sphi %s1260_s19, %s1589_s19   ;;  %s1190_s18 = sphi %s1258_s18, %s1588_s18   ;;  %s1186_s17 = sphi %s1256_s17, %s1587_s17   ;;  %s1182_s16 = sphi %s1254_s16, %s1586_s16   ;;  %s1178_s15 = sphi %s1252_s15, %s1585_s15   ;;  %s1174_s14 = sphi %s1250_s14, %s1584_s14   ;;  %s1170_s13 = sphi %s1248_s13, %s1583_s13   ;;  %s1166_s12 = sphi %s1246_s12, %s1582_s12  }
  0x12   : > { %1557 = sst [smem:[#allocation13_spill]] %s1206_s22  ;;  %s34_s27 = sadd.s32 1, %s1214_s24 }
  0x13   : > { %1558 = sst [smem:[#allocation14_spill]] %s1214_s24  ;;  %p32_p0 = scmp.ge.s32.totalorder %s31_s26, 2 }
  0x14   : > { %s43_s28 = sadd.s32 1, %s1198_s20  ;;  %p50_p1 = scmp.ne.s32.totalorder %s1198_s20, %s1194_s19 }
  0x15   : > { %p51_p2 = scmp.eq.s32.totalorder %s1218_s25, 0  ;;  %s1594_s26 = smov (%p32_p0, %s31_s26), 0 }
  0x16   : > { %1559 = sst [smem:[#allocation15_spill]] %s1594_s26  ;;  %s1596_s27 = smov (!%p32_p0, %s34_s27), %s1214_s24 }
  0x17   : > { %s1327_s29 = ssub.s32 %s1210_s23, %s1594_s26  ;;  %p1331_p3 = por %p51_p2, %p50_p1 }
  0x18   : > { %p36_p4 = scmp.ge.s32.totalorder %s1596_s27, 3  ;;  %p56_p5 = scmp.ne.s32.totalorder %s1194_s19, %s1190_s18 }
  0x19   : > { %p67_p6 = scmp.eq.s32.totalorder %s1327_s29, 0  ;;  %s116_s4 = sadd.s32 1, %s1174_s14 }
  0x1a   : > { %s1598_s27 = smov (%p36_p4, %s1596_s27), 0  ;;  %p1548_p7 = scmp.lt.s32.totalorder %s1218_s25, 6 }
  0x1b   : > { %1561 = sst [smem:[#allocation16_spill]] %s1598_s27  ;;  %s38_s5 = ssub.s32 %s1214_s24, %s1598_s27 }
  0x1c   : > { %s156_s6 = sand.u32 1, %s1198_s20   ;;  %s40_s7 = sor.u32 %s1327_s29, %s38_s5 }
  0x1d   : > { %p114_p8 = scmp.eq.s32.totalorder %s38_s5, 0  ;;  %p41_p9 = scmp.eq.s32.totalorder %s40_s7, 0 }
  0x1e   : > { %s698_s10 = sshll.u32 %s156_s6, 6  ;;  %s780_s11 = sshll.u32 %s1214_s24, 5 }
  0x1f   : > { %s1347_s8 = scalar_select %p114_p8, %s1174_s14, %s116_s4  }
  0x20   : > { %s1350_s9 = scalar_select %p41_p9, %s1198_s20, %s43_s28  }
  0x21   : > { %s165_s26 = sadd.s32 %s1210_s23, %s780_s11  ;;  %s160_s22 = scalar_lea.vmem [#allocation3], %s698_s10 }
  0x22   : > { %s701_s3 = sshll.u32 %s165_s26, 2  ;;  %s170_s27 = sshll.u32 %s160_s22, 4  ;;  %s171_s27 = int_to_ptr.vmem [resolvable:$true] %s170_s27 }
  0x23   : > { %s1562_s0 = sld [smem:[#allocation17_spill]]  ;;  %p877_p10 = pnand %p1548_p7, %p1331_p3 }
  0x24   : > { %p705_p11 = scmp.ge.s32.totalorder %s1218_s25, 1  ;;  %s157_s2 = scalar_lea.sflag [#allocation4], %s156_s6 }
  0x25   : > { %s1549_s21 = smov 64   ;;  %s1550_s22 = smov 4  }
  0x26   : > { %p200_p12 = scmp.lt.s32.totalorder %s1218_s25, 7  ;;  %s694_s26 = sadd.s32 4294967295, %s1218_s25  }
  0x27   : > { %s695_s28 = sadd.s32 4294967294, %s1218_s25   ;;  %p57_p0 = scmp.eq.s32.totalorder %s694_s26, 0 }
  0x28   : > { %p1365_p13 = pnand %p705_p11, %p200_p12  ;;  %s69_s30 = sadd.s32 1, %s1186_s17 }
  0x29   : > { %s167_s1 = scalar_lea.hbm %s1562_s0, %s701_s3  ;;  %s1220_s3 = smov 128  }
  0x2a   : > { %s168_s4 = sshll.u32 %s167_s1, 4  ;;  %p1380_p1 = por %p57_p0, %p56_p5  ;;  %s169_s4 = int_to_ptr.hbm [resolvable:$true] %s168_s4 }
  0x2b   : > { %879 = dma.hbm_to_vmem [thread:$0]  (!%p877_p10), %s169_s4, 1024, %s171_s27, %s157_s2, %s1220_s3, %s1549_s21, %s1550_s22  }
  0x2c   : > { %s1375_s5 = scalar_select %p67_p6, %s1186_s17, %s69_s30  }
  0x2d   : > { %p76_p3 = scmp.ne.s32.totalorder %s1186_s17, %s1182_s16  ;;  %p82_p4 = scmp.ne.s32.totalorder %s1182_s16, %s1178_s15 }
  0x2e   : > { %p126_p8 = scmp.ne.s32.totalorder %s1174_s14, %s1170_s13  ;;  %p127_p10 = scmp.eq.s32.totalorder %s694_s26, 5 }
  0x2f   : > { %p1392_p9 = por %p76_p3, %p51_p2  ;;  %p1396_p11 = por %p82_p4, %p57_p0 }
  0x30   : > { %p132_p6 = scmp.ne.s32.totalorder %s1170_s13, %s1166_s12  ;;  %p1402_p5 = por %p127_p10, %p126_p8 }
  0x31   : > { %p133_p12 = scmp.eq.s32.totalorder %s695_s28, 5  ;;  %s180_s15 = sand.u32 1, %s1186_s17  }
  0x32   : > { %s781_s7 = sshll.u32 %s1210_s23, 6  ;;  %s702_s11 = sshll.u32 %s180_s15, 6 }
  0x33   : > { %p1408_p7 = por %p133_p12, %p132_p6  ;;  %s1569_s3 = sld [smem:[#allocation18_spill]] }
  0x34   : > { %s184_s21 = scalar_lea.vmem [#allocation6], %s702_s11  ;;  %p1570_p2 = scmp.lt.s32.totalorder %s1218_s25, 6 }
  0x35   : > { %s192_s22 = sshll.u32 %s184_s21, 4  ;;  %s181_s28 = scalar_lea.sflag [#allocation7], %s180_s15  ;;  %s193_s22 = int_to_ptr.vmem [resolvable:$true] %s192_s22 }
  0x36   : > { %p880_p0 = pnand %p1570_p2, %p1392_p9  ;;  %s1571_s0 = smov 4  }
  0x37   : > { %s1572_s24 = smov 64   ;;  %204 = sbr.rel (%p1365_p13) target bundleno = 325 (0x145), region = 32 }
  0x38   : > { %s206_s4 = sand.u32 (!%p1365_p13), 1, %s1194_s19  }
  0x39   : > { %s189_s26 = scalar_lea.hbm %s1569_s3, %s781_s7  ;;  %s706_s7 = sshll.u32 (!%p1365_p13), %s206_s4, 6 }
  0x3a   : > { %s190_s30 = sshll.u32 %s189_s26, 4  ;;  %s207_s2 = scalar_lea.sflag (!%p1365_p13), [#allocation4], %s206_s4  ;;  %s191_s30 = int_to_ptr.hbm [resolvable:$true] %s190_s30 }
  0x3b   : > { %882 = dma.hbm_to_vmem [thread:$0]  (!%p880_p0), %s191_s30, 1024, %s193_s22, %s181_s28, %s1572_s24, %s1572_s24, %s1571_s0  }
  0x3c   : > { %s1425_s3 = scalar_lea.vmem [#allocation3], %s706_s7 }
  0x3d   : > { %1153 = dma.done.wait (%p1380_p1), %s207_s2, 1024  }
  0x3e   : > { %1155 = vsyncadd (%p1380_p1), %s207_s2, 4294966272  ;;  %s216_s21 = sand.u32 1, %s1182_s16  }
  0x3f   : > { %s707_s27 = sshll.u32 %s216_s21, 6  ;;  %s217_s0 = scalar_lea.sflag [#allocation7], %s216_s21 }
  0x40   : > { %s1432_s24 = scalar_lea.vmem [#allocation6], %s707_s27 }
  0x41   : > { %1157 = dma.done.wait (%p1396_p11), %s217_s0, 1024  }
  0x42   : > { %1159 = vsyncadd (%p1396_p11), %s217_s0, 4294966272  ;;  %s246_s22 = sand.u32 1, %s1170_s13   ;;  %s1573_s6 = sld [smem:[#allocation12_spill]] }
  0x43   : > { %s708_s1 = sshll.u32 %s246_s22, 6 }
  0x44   : > { %s1441_s15 = scalar_lea.vmem [#allocation8], %s708_s1 }
  0x48   : > { %p709_p13 = scmp.ne.s32.totalorder %s1573_s6, 0 }
  0x4a   : > { %255 = sbr.rel (%p709_p13) target bundleno = 96 (0x60), region = 44 }
  0x4f   : > { %v1223_v0 = vmov 0.0  }
  0x50   : > { %256 = vst [vmem:[#allocation2 + $0x30] sm:$0xff] %v1223_v0 }
  0x51   : > { %257 = vst [vmem:[#allocation2] sm:$0xff] %v1223_v0 }
  0x52   : > { %258 = vst [vmem:[#allocation2 + $0x58] sm:$0xff] %v1223_v0 }
  0x53   : > { %259 = vst [vmem:[#allocation2 + $0x18] sm:$0xff] %v1223_v0 }
  0x54   : > { %260 = vst [vmem:[#allocation2 + $0x50] sm:$0xff] %v1223_v0 }
  0x55   : > { %261 = vst [vmem:[#allocation2 + $0x68] sm:$0xff] %v1223_v0 }
  0x56   : > { %262 = vst [vmem:[#allocation2 + $0x8] sm:$0xff] %v1223_v0 }
  0x57   : > { %263 = vst [vmem:[#allocation2 + $0x48] sm:$0xff] %v1223_v0 }
  0x58   : > { %264 = vst [vmem:[#allocation2 + $0x40] sm:$0xff] %v1223_v0 }
  0x59   : > { %265 = vst [vmem:[#allocation2 + $0x20] sm:$0xff] %v1223_v0 }
  0x5a   : > { %266 = vst [vmem:[#allocation2 + $0x10] sm:$0xff] %v1223_v0 }
  0x5b   : > { %267 = vst [vmem:[#allocation2 + $0x38] sm:$0xff] %v1223_v0 }
  0x5c   : > { %268 = vst [vmem:[#allocation2 + $0x60] sm:$0xff] %v1223_v0 }
  0x5d   : > { %269 = vst [vmem:[#allocation2 + $0x70] sm:$0xff] %v1223_v0 }
  0x5e   : > { %270 = vst [vmem:[#allocation2 + $0x78] sm:$0xff] %v1223_v0 }
  0x5f   : > { %271 = vst [vmem:[#allocation2 + $0x28] sm:$0xff] %v1223_v0 }
  0x60 PF: > { %v797_v1 = vld [vmem:[%s1432_s24 + $0x38] sm:$0xff]  ;;  %v796_v2 = vld [vmem:[%s1432_s24 + $0x30] sm:$0xff]  ;;  %v795_v3 = vld [vmem:[%s1432_s24 + $0x28] sm:$0xff]  ;;  %s1574_s29 = sld [smem:[#allocation12_spill]] }
  0x61   : > { %416 = vmatpush.bf16.msra.mxu0 %v797_v1  ;;  %846 = vmatpush.bf16.msra.mxu1 %v797_v1  ;;  %v794_v4 = vld [vmem:[%s1432_s24 + $0x20] sm:$0xff]  ;;  %v793_v5 = vld [vmem:[%s1432_s24 + $0x18] sm:$0xff]  ;;  %v792_v6 = vld [vmem:[%s1432_s24 + $0x10] sm:$0xff] }
  0x62   : > { %847 = vmatpush.bf16.msra.mxu2 %v797_v1  ;;  %848 = vmatpush.bf16.msra.mxu3 %v797_v1  ;;  %v791_v7 = vld [vmem:[%s1432_s24 + $0x8] sm:$0xff]  ;;  %v790_v8 = vld [vmem:[%s1432_s24] sm:$0xff]  ;;  %v784_v10 = vld [vmem:[%s1425_s3 + $0x10] sm:$0xff] }
  0x63   : > { %v782_v9 = vld [vmem:[%s1425_s3] sm:$0xff]  ;;  %v788_v12 = vld [vmem:[%s1425_s3 + $0x30] sm:$0xff]  ;;  %v783_v13 = vld [vmem:[%s1425_s3 + $0x8] sm:$0xff] }
  0x64   : > { %v786_v11 = vld [vmem:[%s1425_s3 + $0x20] sm:$0xff]  ;;  %v785_v14 = vld [vmem:[%s1425_s3 + $0x18] sm:$0xff]  ;;  %v787_v15 = vld [vmem:[%s1425_s3 + $0x28] sm:$0xff] }
  0x65   : > { %417 = vmatpush.bf16.msra.mxu0 %v796_v2  ;;  %849 = vmatpush.bf16.msra.mxu1 %v796_v2  ;;  %v789_v16 = vld [vmem:[%s1425_s3 + $0x38] sm:$0xff]  ;;  %v272_v17 = vld [vmem:[#allocation2 + $0x30] sm:$0xff]  ;;  %v280_v23 = vld [vmem:[#allocation2 + $0x40] sm:$0xff] }
  0x66   : > { %850 = vmatpush.bf16.msra.mxu2 %v796_v2  ;;  %851 = vmatpush.bf16.msra.mxu3 %v796_v2  ;;  %v276_v18 = vld [vmem:[#allocation2 + $0x50] sm:$0xff]  ;;  %v284_v24 = vld [vmem:[#allocation2 + $0x60] sm:$0xff]  ;;  %v277_v26 = vld [vmem:[#allocation2 + $0x68] sm:$0xff]  ;;  %p774_p1 = scmp.ne.s32.totalorder %s1574_s29, 1 }
  0x67   : > { %v273_v25 = vld [vmem:[#allocation2] sm:$0xff]  ;;  %v285_v36 = vld [vmem:[#allocation2 + $0x70] sm:$0xff]  ;;  %v274_v37 = vld [vmem:[#allocation2 + $0x58] sm:$0xff]  ;;  %s1575_s30 = sld [smem:[#allocation19_spill]] (!%p774_p1) }
  0x68   : > { %v281_v35 = vld [vmem:[#allocation2 + $0x20] sm:$0xff]  ;;  %v278_v38 = vld [vmem:[#allocation2 + $0x8] sm:$0xff]  ;;  %v282_v47 = vld [vmem:[#allocation2 + $0x10] sm:$0xff] }
  0x69   : > { %418 = vmatpush.bf16.msra.mxu0 %v795_v3  ;;  %852 = vmatpush.bf16.msra.mxu1 %v795_v3  ;;  %v286_v48 = vld [vmem:[#allocation2 + $0x78] sm:$0xff]  ;;  %v279_v50 = vld [vmem:[#allocation2 + $0x48] sm:$0xff] }
  0x6a   : > { %853 = vmatpush.bf16.msra.mxu2 %v795_v3  ;;  %854 = vmatpush.bf16.msra.mxu3 %v795_v3  ;;  %v275_v49 = vld [vmem:[#allocation2 + $0x18] sm:$0xff]  ;;  %v287_v60 = vld [vmem:[#allocation2 + $0x28] sm:$0xff] }
  0x6b   : > { %v283_v59 = vld [vmem:[#allocation2 + $0x38] sm:$0xff] }
  0x6d   : > { %419 = vmatpush.bf16.msra.mxu0 %v794_v4  ;;  %855 = vmatpush.bf16.msra.mxu1 %v794_v4 }
  0x6e   : > { %856 = vmatpush.bf16.msra.mxu2 %v794_v4  ;;  %857 = vmatpush.bf16.msra.mxu3 %v794_v4 }
  0x71   : > { %420 = vmatpush.bf16.msra.mxu0 %v793_v5  ;;  %858 = vmatpush.bf16.msra.mxu1 %v793_v5 }
  0x72   : > { %859 = vmatpush.bf16.msra.mxu2 %v793_v5  ;;  %860 = vmatpush.bf16.msra.mxu3 %v793_v5 }
  0x75   : > { %421 = vmatpush.bf16.msra.mxu0 %v792_v6  ;;  %861 = vmatpush.bf16.msra.mxu1 %v792_v6 }
  0x76   : > { %862 = vmatpush.bf16.msra.mxu2 %v792_v6  ;;  %863 = vmatpush.bf16.msra.mxu3 %v792_v6 }
  0x79   : > { %422 = vmatpush.bf16.msra.mxu0 %v791_v7  ;;  %864 = vmatpush.bf16.msra.mxu1 %v791_v7 }
  0x7a   : > { %865 = vmatpush.bf16.msra.mxu2 %v791_v7  ;;  %866 = vmatpush.bf16.msra.mxu3 %v791_v7 }
  0x7d   : > { %423 = vmatpush.bf16.msra.mxu0 %v790_v8  ;;  %867 = vmatpush.bf16.msra.mxu1 %v790_v8 }
  0x7e   : > { %868 = vmatpush.bf16.msra.mxu2 %v790_v8  ;;  %869 = vmatpush.bf16.msra.mxu3 %v790_v8 }
  0x80   : > { %424 = vmatmul.bf16.vlgmr.msra.gmra.mxu0 %v782_v9  ;;  %434 = vmatmul.bf16.vlgmr.msra.gmra.mxu1 %v784_v10 }
  0x81   : > { %444 = vmatmul.bf16.vlgmr.msra.gmra.mxu2 %v786_v11  ;;  %454 = vmatmul.bf16.vlgmr.msra.gmra.mxu3 %v788_v12 }
  0x90   : > { %429 = vmatmul.bf16.gmra.mxu0 %v783_v13  ;;  %439 = vmatmul.bf16.gmra.mxu1 %v785_v14 }
  0x91   : > { %449 = vmatmul.bf16.gmra.mxu2 %v787_v15  ;;  %459 = vmatmul.bf16.gmra.mxu3 %v789_v16 }
  0xfd   : > { %v425_v19 = vpop.f32.mrf.mxu0  ;;  %v435_v20 = vpop.f32.mrf.mxu1 }
  0xfe   : > { %v465_v21 = vadd.f32 %v425_v19, %v272_v17  ;;  %v469_v22 = vadd.f32 %v435_v20, %v276_v18 }
 0x100   : > { %481 = vst [vmem:[#allocation2 + $0x30] sm:$0xff] %v465_v21 }
 0x101   : > { %485 = vst [vmem:[#allocation2 + $0x50] sm:$0xff] %v469_v22 }
 0x104   : > { %v445_v27 = vpop.f32.mrf.mxu2  ;;  %v455_v28 = vpop.f32.mrf.mxu3 }
 0x105   : > { %v473_v29 = vadd.f32 %v445_v27, %v280_v23  ;;  %v477_v30 = vadd.f32 %v455_v28, %v284_v24  ;;  %v427_v31 = vpop.f32.mrf.mxu0  ;;  %v437_v32 = vpop.f32.mrf.mxu1 }
 0x106   : > { %v466_v33 = vadd.f32 %v427_v31, %v273_v25  ;;  %v470_v34 = vadd.f32 %v437_v32, %v277_v26 }
 0x107   : > { %489 = vst [vmem:[#allocation2 + $0x40] sm:$0xff] %v473_v29 }
 0x108   : > { %493 = vst [vmem:[#allocation2 + $0x60] sm:$0xff] %v477_v30 }
 0x109   : > { %482 = vst [vmem:[#allocation2] sm:$0xff] %v466_v33 }
 0x10a   : > { %486 = vst [vmem:[#allocation2 + $0x68] sm:$0xff] %v470_v34 }
 0x10c   : > { %v447_v39 = vpop.f32.mrf.mxu2  ;;  %v457_v40 = vpop.f32.mrf.mxu3 }
 0x10d   : > { %v474_v41 = vadd.f32 %v447_v39, %v281_v35  ;;  %v478_v42 = vadd.f32 %v457_v40, %v285_v36  ;;  %v430_v43 = vpop.f32.mrf.mxu0  ;;  %v440_v44 = vpop.f32.mrf.mxu1 }
 0x10e   : > { %v467_v45 = vadd.f32 %v430_v43, %v274_v37  ;;  %v471_v46 = vadd.f32 %v440_v44, %v278_v38 }
 0x10f   : > { %490 = vst [vmem:[#allocation2 + $0x20] sm:$0xff] %v474_v41 }
 0x110   : > { %494 = vst [vmem:[#allocation2 + $0x70] sm:$0xff] %v478_v42 }
 0x111   : > { %483 = vst [vmem:[#allocation2 + $0x58] sm:$0xff] %v467_v45 }
 0x112   : > { %487 = vst [vmem:[#allocation2 + $0x8] sm:$0xff] %v471_v46 }
 0x114   : > { %v450_v51 = vpop.f32.mrf.mxu2  ;;  %v460_v52 = vpop.f32.mrf.mxu3 }
 0x115   : > { %v475_v53 = vadd.f32 %v450_v51, %v282_v47  ;;  %v479_v54 = vadd.f32 %v460_v52, %v286_v48  ;;  %v432_v55 = vpop.f32.mrf.mxu0  ;;  %v442_v56 = vpop.f32.mrf.mxu1 }
 0x116   : > { %v468_v57 = vadd.f32 %v432_v55, %v275_v49  ;;  %v472_v58 = vadd.f32 %v442_v56, %v279_v50 }
 0x117   : > { %491 = vst [vmem:[#allocation2 + $0x10] sm:$0xff] %v475_v53 }
 0x118   : > { %495 = vst [vmem:[#allocation2 + $0x78] sm:$0xff] %v479_v54 }
 0x119   : > { %484 = vst [vmem:[#allocation2 + $0x18] sm:$0xff] %v468_v57 }
 0x11a   : > { %488 = vst [vmem:[#allocation2 + $0x48] sm:$0xff] %v472_v58 }
 0x11c   : > { %v452_v61 = vpop.f32.mrf.mxu2  ;;  %v462_v62 = vpop.f32.mrf.mxu3  ;;  %500 = sbr.rel (%p774_p1) target bundleno = 303 (0x12f), region = 48 }
 0x11d   : > { %v476_v63 = vadd.f32 %v452_v61, %v283_v59  ;;  %v480_v0 = vadd.f32 %v462_v62, %v287_v60 }
 0x11f   : > { %492 = vst [vmem:[#allocation2 + $0x38] sm:$0xff] %v476_v63 }
 0x120   : > { %496 = vst [vmem:[#allocation2 + $0x28] sm:$0xff] %v480_v0 }
 0x121   : > { %v501_v1 = vld [vmem:[#allocation2 + $0x30] sm:$0xff]  ;;  %v502_v2 = vld [vmem:[#allocation2] sm:$0xff]  ;;  %v503_v4 = vld [vmem:[#allocation2 + $0x58] sm:$0xff] }
 0x122   : > { %v1007_v3 = vld [vmem:[%s1575_s30] ss:$0 sm:$0xff]  ;;  %v504_v5 = vld [vmem:[#allocation2 + $0x18] sm:$0xff]  ;;  %v505_v6 = vld [vmem:[#allocation2 + $0x50] sm:$0xff] }
 0x123   : > { %v506_v7 = vld [vmem:[#allocation2 + $0x68] sm:$0xff]  ;;  %v521_v9 = vadd.f32 %v1007_v3, %v501_v1  ;;  %v522_v10 = vadd.f32 %v1007_v3, %v502_v2  ;;  %v523_v11 = vadd.f32 %v1007_v3, %v503_v4  ;;  %v524_v12 = vadd.f32 %v1007_v3, %v504_v5  ;;  %v509_v14 = vld [vmem:[#allocation2 + $0x40] sm:$0xff]  ;;  %v511_v20 = vld [vmem:[#allocation2 + $0x10] sm:$0xff] }
 0x124   : > { %v507_v8 = vld [vmem:[#allocation2 + $0x8] sm:$0xff]  ;;  %v510_v15 = vld [vmem:[#allocation2 + $0x20] sm:$0xff]  ;;  %v525_v16 = vadd.f32 %v1007_v3, %v505_v6  ;;  %v526_v17 = vadd.f32 %v1007_v3, %v506_v7  ;;  %v529_v25 = vadd.f32 %v1007_v3, %v509_v14  ;;  %v514_v27 = vld [vmem:[#allocation2 + $0x70] sm:$0xff]  ;;  %v531_v32 = vadd.f32 %v1007_v3, %v511_v20 }
 0x125   : > { %v508_v13 = vld [vmem:[#allocation2 + $0x48] sm:$0xff]  ;;  %v527_v18 = vadd.f32 %v1007_v3, %v507_v8  ;;  %v513_v22 = vld [vmem:[#allocation2 + $0x60] sm:$0xff]  ;;  %v802_v23 = vpack.c.bf16 %v522_v10, %v521_v9  ;;  %v807_v24 = vpack.c.bf16 %v524_v12, %v523_v11  ;;  %v530_v26 = vadd.f32 %v1007_v3, %v510_v15  ;;  %v515_v28 = vld [vmem:[#allocation2 + $0x78] sm:$0xff] }
 0x126   : > { %v528_v19 = vadd.f32 %v1007_v3, %v508_v13  ;;  %v512_v21 = vld [vmem:[#allocation2 + $0x38] sm:$0xff]  ;;  %v812_v30 = vpack.c.bf16 %v526_v17, %v525_v16  ;;  %v533_v35 = vadd.f32 %v1007_v3, %v513_v22  ;;  %v534_v36 = vadd.f32 %v1007_v3, %v514_v27 }
 0x127   : > { %v516_v29 = vld [vmem:[#allocation2 + $0x28] sm:$0xff]  ;;  %v532_v33 = vadd.f32 %v1007_v3, %v512_v21  ;;  %803 = vst [vmem:[%s1441_s15] sm:$0xff] %v802_v23   ;;  %v822_v34 = vpack.c.bf16 %v530_v26, %v529_v25  ;;  %v535_v37 = vadd.f32 %v1007_v3, %v515_v28 }
 0x128   : > { %v817_v31 = vpack.c.bf16 %v528_v19, %v527_v18  ;;  %839 = vst [vmem:[%s1441_s15 + $0x8] sm:$0xff] %v807_v24   ;;  %v536_v39 = vadd.f32 %v1007_v3, %v516_v29  ;;  %v832_v40 = vpack.c.bf16 %v534_v36, %v533_v35 }
 0x129   : > { %v827_v38 = vpack.c.bf16 %v532_v33, %v531_v32  ;;  %840 = vst [vmem:[%s1441_s15 + $0x10] sm:$0xff] %v812_v30  }
 0x12a   : > { %841 = vst [vmem:[%s1441_s15 + $0x18] sm:$0xff] %v817_v31   ;;  %v837_v41 = vpack.c.bf16 %v536_v39, %v535_v37 }
 0x12b   : > { %842 = vst [vmem:[%s1441_s15 + $0x20] sm:$0xff] %v822_v34  }
 0x12c   : > { %843 = vst [vmem:[%s1441_s15 + $0x28] sm:$0xff] %v827_v38  }
 0x12d   : > { %844 = vst [vmem:[%s1441_s15 + $0x30] sm:$0xff] %v832_v40  }
 0x12e   : > { %845 = vst [vmem:[%s1441_s15 + $0x38] sm:$0xff] %v837_v41  }
 0x12f PF: > { %s1576_s28 = sld [smem:[#allocation13_spill]]  ;;  %s582_s27 = sshll.u32 %s1441_s15, 4  ;;  %s583_s27 = int_to_ptr.vmem [resolvable:$true] %s582_s27 }
 0x130   : > { %s1577_s3 = sld [smem:[#allocation20_spill]]  ;;  %s570_s24 = scalar_lea.sflag [#allocation5], %s246_s22 }
 0x135   : > { %s798_s4 = sshll.u32 %s1576_s28, 6 }
 0x136   : > { %s581_s21 = scalar_lea.hbm %s1577_s3, %s798_s4  ;;  %s1088_s26 = scalar_lea.hbm %s1577_s3, 192 }
 0x137   : > { %s584_s0 = sshll.u32 %s581_s21, 4  ;;  %s585_s0 = int_to_ptr.hbm [resolvable:$true] %s584_s0 }
 0x138   : > { %s1082_s1 = sshra.s32 %s585_s0, 4  ;;  %s1083_s1 = int_to_ptr.hbm [resolvable:$true] %s1082_s1 }
 0x139   : > { %s1084_s6 = scalar_lea.hbm %s1083_s1, 64  ;;  %p1089_p9 = scmp.lt.s32.totalorder %s1083_s1, %s1577_s3 }
 0x13a   : > { %p1085_p3 = scmp.ne.s32.totalorder %s1083_s1, %s1084_s6  ;;  %p1090_p10 = scmp.lt.s32.totalorder %s1088_s26, %s1084_s6 }
 0x13c   : > { %p1086_p4 = pnand %p1085_p3, %p1402_p5  ;;  %p1091_p11 = por %p1090_p10, %p1089_p9 }
 0x13e   : > { %p1087_p8 = pneg %p1086_p4 }
 0x140   : > { %p1092_p6 = pnand %p1091_p11, %p1087_p8 }
 0x142   : > { %1095 = shalt.err (!%p1092_p6)
}
 0x143   : > { %s1224_s22 = smov 64   ;;  %s1225_s15 = smov 4  }
 0x144   : > { %874 = dma.vmem_to_hbm [thread:$0]  (%p1402_p5), %s583_s27, 1024, %s585_s0, %s570_s24, %s1224_s22, %s1224_s22, %s1225_s15  }
 0x145 PF: > { %p888_p12 = scmp.ge.s32.totalorder %s1218_s25, 2  ;;  %s599_s4 = sand.u32 1, %s1166_s12  }
 0x146   : > { %s600_s7 = scalar_lea.sflag [#allocation5], %s599_s4 }
 0x147   : > { %p884_p2 = pnand %p888_p12, %p1408_p7 }
 0x149   : > { %p885_p0 = pneg %p884_p2 }
 0x14b   : > { %1161 = dma.done.wait (%p885_p0), %s600_s7, 1024  }
 0x14c   : > { %1163 = vsyncadd (%p885_p0), %s600_s7, 4294966272  ;;  %s22_s25 = sadd.s32 1, %s1218_s25   ;;  %s1579_s22 = sld [smem:[#allocation14_spill]] }
 0x14d   : > { %p1494_p13 = scmp.ge.s32.totalorder %s22_s25, 8   ;;  %s1580_s10 = sld [smem:[#allocation15_spill]] }
 0x14e   : > { %s1581_s24 = sld [smem:[#allocation16_spill]]  ;;  %s1582_s12 = smov %s1170_s13 }
 0x14f   : > { %s1583_s13 = smov %s1174_s14  ;;  %s1584_s14 = smov %s1347_s8 }
 0x150   : > { %s1585_s15 = smov %s1182_s16  ;;  %s1586_s16 = smov %s1186_s17 }
 0x151   : > { %s1587_s17 = smov %s1375_s5  ;;  %s1588_s18 = smov %s1194_s19 }
 0x152   : > { %s1589_s19 = smov %s1198_s20  ;;  %s1590_s20 = smov %s1350_s9 }
 0x153   : > { %s1591_s21 = smov %s1210_s23  ;;  %s1592_s23 = smov %s1580_s10 }
 0x154   :  { %21 = sbr.rel (!%p1494_p13) target bundleno = 17 (0x11), region = 98 }
 0x159   :  { %606 = vsyncpa [#allocation4], 1 }
 0x15a   :  { %608 = vsyncpa [#allocation4 + $0x1], 1 }
 0x15b   :  { %609 = vsyncpa [#allocation7], 1 }
 0x15c   :  { %611 = vsyncpa [#allocation7 + $0x1], 1 }
 0x15d   :  { %612 = vsyncpa [#allocation5], 1 }
 0x15e   :  { %614 = vsyncpa [#allocation5 + $0x1], 1 }

</bundles_post_ra>
